<compile_context>
chip_gen: v7x
topology: tpu7x:2x2x1
jax: 0.10.0
libtpu: 0.0.40
codegen_flags: <defaults>
</compile_context>

<pallas_src>
import functools

import jax
import jax.numpy as jnp
from jax.experimental import pallas as pl
from jax.experimental.pallas import tpu as pltpu

LANES = 128


def _fused_convblock_kernel(x_ref, *refs, n_batch, dims):
    """Whole ConvBlock (all layers, whole batch) in one invocation.

    x_ref : (n_batch*H, 128)        VMEM bf16  lane-dense, zero-padded rows
    refs  : (w1, b1, w2, b2, ..., o_ref)
      w_l : (KH*128, 128)           VMEM bf16  banded conv weights stacked along K
      b_l : (1, 128)                VMEM f32   bias tiled across W_out, zero-padded
    o_ref : (n_batch*H_out, 128)    VMEM f32
    dims[l] = (KH, h_in, h_out)     static per-layer row geometry
    """
    o_ref = refs[-1]
    n_layers = (len(refs) - 1) // 2

    a = x_ref[...]  # (n_batch*H, 128) bf16

    for l in range(n_layers):
        w_ref = refs[2 * l]
        b_ref = refs[2 * l + 1]
        KH, h_in, h_out = dims[l]

        # Row-im2col: per batch element, concatenate the KH sublane-shifted
        # windows along the lane axis (each piece is a full 128-lane vreg
        # column), then stack the batch elements along M.
        rows = []
        for n in range(n_batch):
            base = n * h_in
            pieces = [a[base + ky: base + ky + h_out, :] for ky in range(KH)]
            rows.append(jnp.concatenate(pieces, axis=-1))       # (h_out, KH*128)
        lhs = rows[0] if n_batch == 1 else jnp.concatenate(rows, axis=0)

        # One MXU call per layer: (n_batch*h_out, KH*128) @ (KH*128, 128),
        # bf16 operands, f32 accumulation.
        acc = jnp.dot(lhs, w_ref[...], preferred_element_type=jnp.float32)

        # Single f32 bias + ReLU epilogue.
        act = jnp.maximum(acc + b_ref[...], 0.0)

        if l + 1 < n_layers:
            a = act.astype(jnp.bfloat16)
        else:
            o_ref[...] = act.astype(o_ref.dtype)


def _banded_weight(w_oihw, W_in):
    """OIHW conv weight -> KH banded matmul weights (built once, wrapper glue).

    band[ky, jin*C_in + c, jout*C_out + co] = w[co, c, ky, jin - jout]
    (zero when jin - jout is outside [0, KW)), so that
    (H, W_in*C_in) @ band[ky] implements the kx/c part of a VALID conv.
    """
    C_out, C_in, KH, KW = w_oihw.shape
    W_out = W_in - KW + 1
    w_hwio = jnp.transpose(w_oihw, (2, 3, 1, 0)).astype(jnp.float32)  # (KH,KW,Ci,Co)

    kxs = jnp.arange(KW)[:, None, None]
    jins = jnp.arange(W_in)[None, :, None]
    jouts = jnp.arange(W_out)[None, None, :]
    sel = (jins == jouts + kxs).astype(jnp.float32)            # (KW, W_in, W_out)

    bands = jnp.einsum("kij,ykcd->yicjd", sel, w_hwio)         # (KH,W_in,Ci,W_out,Co)
    return bands.reshape(KH, W_in * C_in, W_out * C_out)


def _pad_to_lanes(n):
    return max(LANES, ((n + LANES - 1) // LANES) * LANES)


def make_conv_block_forward(params, in_shape):
    """Build a jitted ConvBlock forward.  All weight prep happens ONCE here."""
    N, C_in, H, W = in_shape

    operands = []
    dims = []
    h, w, c = H, W, C_in
    wc_in_pad = _pad_to_lanes(w * c)
    x_lanes = wc_in_pad

    for (w_oihw, b) in params:
        co, ci, kh, kw = w_oihw.shape
        assert ci == c, "channel mismatch in ConvBlock params"
        h_out, w_out = h - kh + 1, w - kw + 1
        wc_out_pad = _pad_to_lanes(w_out * co)

        band = _banded_weight(w_oihw, w)                        # (kh, w*ci, w_out*co)
        band = jnp.pad(band, ((0, 0),
                              (0, wc_in_pad - w * ci),
                              (0, wc_out_pad - w_out * co)))
        wmat = band.reshape(kh * wc_in_pad, wc_out_pad).astype(jnp.bfloat16)

        brow = jnp.pad(jnp.tile(b.astype(jnp.float32), w_out),
                       (0, wc_out_pad - w_out * co)).reshape(1, wc_out_pad)

        operands += [wmat, brow]
        dims.append((kh, h, h_out))
        h, w, c = h_out, w_out, co
        wc_in_pad = wc_out_pad

    H_out, W_out, C_out = h, w, c
    out_lanes = wc_in_pad

    kernel = functools.partial(_fused_convblock_kernel,
                               n_batch=N, dims=tuple(dims))

    in_specs = [pl.BlockSpec((N * H, x_lanes), lambda i: (0, 0))]
    for op in operands:
        in_specs.append(pl.BlockSpec(op.shape, lambda i: (0, 0)))

    pcall = pl.pallas_call(
        kernel,
        out_shape=jax.ShapeDtypeStruct((N * H_out, out_lanes), jnp.float32),
        grid_spec=pltpu.PrefetchScalarGridSpec(
            num_scalar_prefetch=0,
            grid=(1,),                                  # single invocation, batch in M
            in_specs=in_specs,
            out_specs=pl.BlockSpec((N * H_out, out_lanes), lambda i: (0, 0)),
        ),
        compiler_params=pltpu.CompilerParams(
            dimension_semantics=("arbitrary",)),
    )

    @jax.jit
    def forward(x_nchw):
        # NCHW -> lane-dense (N*H, 128) bf16 rows (glue, fused by XLA).
        x_rows = jnp.transpose(x_nchw, (0, 2, 3, 1)).reshape(N * H, W * C_in)
        x_rows = jnp.pad(x_rows, ((0, 0), (0, x_lanes - W * C_in)))
        x_rows = x_rows.astype(jnp.bfloat16)

        out = pcall(x_rows, *operands)                  # (N*H_out, 128) f32

        # lane-dense -> NCHW (glue).
        out = out[:, : W_out * C_out].reshape(N, H_out, W_out, C_out)
        return jnp.transpose(out, (0, 3, 1, 2))

    return forward


def init_conv_block_params(key, C_in, C_out, block_size, kernel_size,
                           decoder_block=False):
    """Deterministic synthetic parameters, PyTorch OIHW weight layout."""
    if not decoder_block:
        channels = [(C_in, C_out)] + [(C_out, C_out)] * (block_size - 1)
    else:
        channels = [(C_in, C_in)] * (block_size - 1) + [(C_in, C_out)]
    params = []
    for (ci, co) in channels:
        key, kw, kb = jax.random.split(key, 3)
        fan_in = ci * kernel_size * kernel_size
        bound = 1.0 / jnp.sqrt(fan_in)
        w = jax.random.uniform(kw, (co, ci, kernel_size, kernel_size),
                               jnp.float32, -bound, bound)     # OIHW (torch)
        bvec = jax.random.uniform(kb, (co,), jnp.float32, -bound, bound)
        params.append((w, bvec))
    return params


def _reference_forward(x_nchw, params):
    """Pure-JAX reference (lax.conv, f32) for correctness checking."""
    x = x_nchw
    for w_oihw, b in params:
        y = jax.lax.conv_general_dilated(
            x, w_oihw, window_strides=(1, 1), padding="VALID",
            dimension_numbers=("NCHW", "OIHW", "NCHW"))
        x = jnp.maximum(y + b.reshape(1, -1, 1, 1), 0.0)
    return x


if __name__ == "__main__":
    key = jax.random.PRNGKey(0)
    k_x, k_p = jax.random.split(key)

    N, C_in, H, W = 2, 4, 16, 16
    C_out, block_size, kernel_size = 8, 2, 3

    x = jax.random.normal(k_x, (N, C_in, H, W), jnp.float32)
    params = init_conv_block_params(k_p, C_in, C_out, block_size, kernel_size,
                                    decoder_block=False)

    forward = make_conv_block_forward(params, x.shape)   # weight prep hoisted here

    out = jax.block_until_ready(forward(x))
    ref = jax.block_until_ready(_reference_forward(x, params))

    assert out.shape == (N, C_out, H - 2 * (kernel_size - 1),
                         W - 2 * (kernel_size - 1)), out.shape
    # bf16 matmul operands (f32 accumulation) -> relaxed tolerance vs f32 reference.
    assert jnp.allclose(out, ref, atol=2e-2, rtol=2e-2), "mismatch vs reference"

    print("KERNEL_OK")
</pallas_src>

<mosaic_0001>
module attributes {stable_mosaic.version = 11 : i64} {
  func.func @_fused_convblock_kernel(%arg0: i32, %arg1: memref<32x128xbf16, #tpu.memory_space<vmem>>, %arg2: memref<384x128xbf16, #tpu.memory_space<vmem>>, %arg3: memref<1x128xf32, #tpu.memory_space<vmem>>, %arg4: memref<384x128xbf16, #tpu.memory_space<vmem>>, %arg5: memref<1x128xf32, #tpu.memory_space<vmem>>, %arg6: memref<24x128xf32, #tpu.memory_space<vmem>>) attributes {dimension_semantics = [#tpu.dimension_semantics<arbitrary>], iteration_bounds = array<i64: 1>, scalar_prefetch = 0 : i64, scratch_operands = 0 : i64, tpu.core_type = #tpu.core_type<tc>, window_params = [{pipeline_mode = #tpu.pipeline_mode<synchronous>, transform_indices = @transform_0, window_bounds = array<i64: 32, 128>}, {pipeline_mode = #tpu.pipeline_mode<synchronous>, transform_indices = @transform_1, window_bounds = array<i64: 384, 128>}, {pipeline_mode = #tpu.pipeline_mode<synchronous>, transform_indices = @transform_2, window_bounds = array<i64: 1, 128>}, {pipeline_mode = #tpu.pipeline_mode<synchronous>, transform_indices = @transform_3, window_bounds = array<i64: 384, 128>}, {pipeline_mode = #tpu.pipeline_mode<synchronous>, transform_indices = @transform_4, window_bounds = array<i64: 1, 128>}, {pipeline_mode = #tpu.pipeline_mode<synchronous>, transform_indices = @transform_5, window_bounds = array<i64: 24, 128>}]} {
    %c0 = arith.constant 0 : index
    %c0_0 = arith.constant 0 : index
    %0 = vector.load %arg1[%c0, %c0_0] : memref<32x128xbf16, #tpu.memory_space<vmem>>, vector<32x128xbf16>
    %1 = vector.extract_strided_slice %0 {offsets = [0, 0], sizes = [14, 128], strides = [1, 1]} : vector<32x128xbf16> to vector<14x128xbf16>
    %2 = vector.extract_strided_slice %0 {offsets = [1, 0], sizes = [14, 128], strides = [1, 1]} : vector<32x128xbf16> to vector<14x128xbf16>
    %3 = vector.extract_strided_slice %0 {offsets = [2, 0], sizes = [14, 128], strides = [1, 1]} : vector<32x128xbf16> to vector<14x128xbf16>
    %4 = tpu.concatenate %1, %2, %3 in 1 : vector<14x128xbf16>, vector<14x128xbf16>, vector<14x128xbf16> -> vector<14x384xbf16>
    %5 = vector.extract_strided_slice %0 {offsets = [16, 0], sizes = [14, 128], strides = [1, 1]} : vector<32x128xbf16> to vector<14x128xbf16>
    %6 = vector.extract_strided_slice %0 {offsets = [17, 0], sizes = [14, 128], strides = [1, 1]} : vector<32x128xbf16> to vector<14x128xbf16>
    %7 = vector.extract_strided_slice %0 {offsets = [18, 0], sizes = [14, 128], strides = [1, 1]} : vector<32x128xbf16> to vector<14x128xbf16>
    %8 = tpu.concatenate %5, %6, %7 in 1 : vector<14x128xbf16>, vector<14x128xbf16>, vector<14x128xbf16> -> vector<14x384xbf16>
    %9 = tpu.concatenate %4, %8 in 0 : vector<14x384xbf16>, vector<14x384xbf16> -> vector<28x384xbf16>
    %c0_1 = arith.constant 0 : index
    %c0_2 = arith.constant 0 : index
    %10 = vector.load %arg2[%c0_1, %c0_2] : memref<384x128xbf16, #tpu.memory_space<vmem>>, vector<384x128xbf16>
    %cst = arith.constant dense<0.000000e+00> : vector<28x128xf32>
    %11 = tpu.matmul %9, %10, %cst {dimension_numbers = #tpu.dot_dimension_numbers<[1], [0], [0], [1], [0, 0, 1, 1], [], []>} : vector<28x384xbf16>, vector<384x128xbf16>, vector<28x128xf32> -> vector<28x128xf32>
    %c0_3 = arith.constant 0 : index
    %c0_4 = arith.constant 0 : index
    %12 = vector.load %arg3[%c0_3, %c0_4] : memref<1x128xf32, #tpu.memory_space<vmem>>, vector<1x128xf32>
    %13 = vector.broadcast %12 : vector<1x128xf32> to vector<28x128xf32>
    %14 = arith.addf %11, %13 : vector<28x128xf32>
    %cst_5 = arith.constant 0.000000e+00 : f32
    %15 = vector.broadcast %cst_5 : f32 to vector<28x128xf32>
    %16 = arith.maximumf %14, %15 : vector<28x128xf32>
    %17 = arith.truncf %16 : vector<28x128xf32> to vector<28x128xbf16>
    %18 = vector.extract_strided_slice %17 {offsets = [0, 0], sizes = [12, 128], strides = [1, 1]} : vector<28x128xbf16> to vector<12x128xbf16>
    %19 = vector.extract_strided_slice %17 {offsets = [1, 0], sizes = [12, 128], strides = [1, 1]} : vector<28x128xbf16> to vector<12x128xbf16>
    %20 = vector.extract_strided_slice %17 {offsets = [2, 0], sizes = [12, 128], strides = [1, 1]} : vector<28x128xbf16> to vector<12x128xbf16>
    %21 = tpu.concatenate %18, %19, %20 in 1 : vector<12x128xbf16>, vector<12x128xbf16>, vector<12x128xbf16> -> vector<12x384xbf16>
    %22 = vector.extract_strided_slice %17 {offsets = [14, 0], sizes = [12, 128], strides = [1, 1]} : vector<28x128xbf16> to vector<12x128xbf16>
    %23 = vector.extract_strided_slice %17 {offsets = [15, 0], sizes = [12, 128], strides = [1, 1]} : vector<28x128xbf16> to vector<12x128xbf16>
    %24 = vector.extract_strided_slice %17 {offsets = [16, 0], sizes = [12, 128], strides = [1, 1]} : vector<28x128xbf16> to vector<12x128xbf16>
    %25 = tpu.concatenate %22, %23, %24 in 1 : vector<12x128xbf16>, vector<12x128xbf16>, vector<12x128xbf16> -> vector<12x384xbf16>
    %26 = tpu.concatenate %21, %25 in 0 : vector<12x384xbf16>, vector<12x384xbf16> -> vector<24x384xbf16>
    %c0_6 = arith.constant 0 : index
    %c0_7 = arith.constant 0 : index
    %27 = vector.load %arg4[%c0_6, %c0_7] : memref<384x128xbf16, #tpu.memory_space<vmem>>, vector<384x128xbf16>
    %cst_8 = arith.constant dense<0.000000e+00> : vector<24x128xf32>
    %28 = tpu.matmul %26, %27, %cst_8 {dimension_numbers = #tpu.dot_dimension_numbers<[1], [0], [0], [1], [0, 0, 1, 1], [], []>} : vector<24x384xbf16>, vector<384x128xbf16>, vector<24x128xf32> -> vector<24x128xf32>
    %c0_9 = arith.constant 0 : index
    %c0_10 = arith.constant 0 : index
    %29 = vector.load %arg5[%c0_9, %c0_10] : memref<1x128xf32, #tpu.memory_space<vmem>>, vector<1x128xf32>
    %30 = vector.broadcast %29 : vector<1x128xf32> to vector<24x128xf32>
    %31 = arith.addf %28, %30 : vector<24x128xf32>
    %cst_11 = arith.constant 0.000000e+00 : f32
    %32 = vector.broadcast %cst_11 : f32 to vector<24x128xf32>
    %33 = arith.maximumf %31, %32 : vector<24x128xf32>
    %c0_12 = arith.constant 0 : index
    %c0_13 = arith.constant 0 : index
    %34 = vector.load %arg6[%c0_12, %c0_13] : memref<24x128xf32, #tpu.memory_space<vmem>>, vector<24x128xf32>
    tpu.vector_store %arg6[%c0_12, %c0_13], %33 {strides = array<i32>} : memref<24x128xf32, #tpu.memory_space<vmem>>, vector<24x128xf32>,
    return
  }
  func.func @transform_0(%arg0: i32) -> (i32, i32) {
    %c0_i32 = arith.constant 0 : i32
    %c0_i32_0 = arith.constant 0 : i32
    %c0_i32_1 = arith.constant 0 : i32
    return %c0_i32, %c0_i32_0 : i32, i32
  }
  func.func @transform_1(%arg0: i32) -> (i32, i32) {
    %c0_i32 = arith.constant 0 : i32
    %c0_i32_0 = arith.constant 0 : i32
    %c0_i32_1 = arith.constant 0 : i32
    return %c0_i32, %c0_i32_0 : i32, i32
  }
  func.func @transform_2(%arg0: i32) -> (i32, i32) {
    %c0_i32 = arith.constant 0 : i32
    %c0_i32_0 = arith.constant 0 : i32
    %c0_i32_1 = arith.constant 0 : i32
    return %c0_i32, %c0_i32_0 : i32, i32
  }
  func.func @transform_3(%arg0: i32) -> (i32, i32) {
    %c0_i32 = arith.constant 0 : i32
    %c0_i32_0 = arith.constant 0 : i32
    %c0_i32_1 = arith.constant 0 : i32
    return %c0_i32, %c0_i32_0 : i32, i32
  }
  func.func @transform_4(%arg0: i32) -> (i32, i32) {
    %c0_i32 = arith.constant 0 : i32
    %c0_i32_0 = arith.constant 0 : i32
    %c0_i32_1 = arith.constant 0 : i32
    return %c0_i32, %c0_i32_0 : i32, i32
  }
  func.func @transform_5(%arg0: i32) -> (i32, i32) {
    %c0_i32 = arith.constant 0 : i32
    %c0_i32_0 = arith.constant 0 : i32
    %c0_i32_1 = arith.constant 0 : i32
    return %c0_i32, %c0_i32_0 : i32, i32
  }
}

</mosaic_0001>

<bundles_post_ra>
// kernel: forward.1
= control target key start
LH: loop header
LB: loop body
LE: loop exit
PB: predicated region body
PF: predicated region fallthrough
CT: control target
= control target key end

     0   :  { %vm56_vm0 = vcmask 1046528   ;;  %vm401_vm1 = vcmask 1045504   ;;  %vm380_vm2 = vsmask.f32 7424  ;;  %s1139_s1 = inlined_call_operand.vmem [shape: bf16[384,128], index: 1, kind: input, shape index: {}]   ;;  %s1140_s0 = inlined_call_operand.vmem [shape: bf16[32,128], index: 0, kind: input, shape index: {}]   ;;  %s1141_s3 = inlined_call_operand.vmem [shape: bf16[384,128], index: 3, kind: input, shape index: {}]   ;;  %s1142_s2 = inlined_call_operand.vmem [shape: f32[1,128], index: 2, kind: input, shape index: {}]   ;;  %s1143_s4 = inlined_call_operand.vmem [shape: f32[1,128], index: 4, kind: input, shape index: {}]   ;;  %s1144_s5 = inlined_call_operand.vmem [shape: f32[24,128], index: 5, kind: output, shape index: {}]  }
   0x1   :  { %v886_v0 = vld [vmem:[%s1139_s1 + $0x40] sm:$0xff]   ;;  %v888_v2 = vld [vmem:[%s1139_s1 + $0x48] sm:$0xff]   ;;  %v891_v5 = vld [vmem:[%s1139_s1 + $0x50] sm:$0xff]  }
   0x2   :  { %v887_v1 = vld [vmem:[%s1139_s1] sm:$0xff]   ;;  %770 = vmatprep.subr.bf16.mxu0 %v886_v0  ;;  %v890_v4 = vld [vmem:[%s1139_s1 + $0x8] sm:$0xff]   ;;  %v893_v7 = vld [vmem:[%s1139_s1 + $0x10] sm:$0xff]  }
   0x3   :  { %771 = vmatpush3.bf16.msra.mxu0 %v887_v1  ;;  %v889_v3 = vld [vmem:[%s1139_s1 + $0x80] sm:$0xff]   ;;  %v892_v6 = vld [vmem:[%s1139_s1 + $0x88] sm:$0xff]   ;;  %v894_v8 = vld [vmem:[%s1139_s1 + $0x58] sm:$0xff]  }
   0x4   :  { %772 = vmatprep.subr.bf16.mxu0 %v888_v2  ;;  %846 = vmatprep.subr.bf16.mxu1 %v889_v3  ;;  %v895_v9 = vld [vmem:[%s1139_s1 + $0x90] sm:$0xff]   ;;  %v896_v10 = vld [vmem:[%s1139_s1 + $0x18] sm:$0xff]   ;;  %v897_v11 = vld [vmem:[%s1139_s1 + $0x60] sm:$0xff]  }
   0x5   :  { %847 = vmatpush3.bf16.msra.mxu1 %v889_v3  ;;  %v898_v12 = vld [vmem:[%s1139_s1 + $0x98] sm:$0xff]   ;;  %v899_v13 = vld [vmem:[%s1139_s1 + $0x20] sm:$0xff]   ;;  %v900_v15 = vld [vmem:[%s1139_s1 + $0x68] sm:$0xff]  }
   0x6   :  { %848 = vmatprep.subr.bf16.mxu1 %v892_v6  ;;  %v901_v14 = vld [vmem:[%s1139_s1 + $0xa0] sm:$0xff]   ;;  %v902_v16 = vld [vmem:[%s1139_s1 + $0x28] sm:$0xff]   ;;  %v903_v18 = vld [vmem:[%s1139_s1 + $0x70] sm:$0xff]  }
   0x7   :  { %773 = vmatpush3.bf16.msra.mxu0 %v890_v4  ;;  %v904_v17 = vld [vmem:[%s1139_s1 + $0xa8] sm:$0xff]   ;;  %v905_v19 = vld [vmem:[%s1139_s1 + $0x30] sm:$0xff]   ;;  %v906_v20 = vld [vmem:[%s1139_s1 + $0x78] sm:$0xff]  }
   0x8   :  { %774 = vmatprep.subr.bf16.mxu0 %v891_v5  ;;  %v907_v21 = vld [vmem:[%s1139_s1 + $0xb0] sm:$0xff]   ;;  %v909_v22 = vld [vmem:[%s1140_s0] sm:$0xff]   ;;  %v910_v23 = vld [vmem:[%s1140_s0 + $0x8] sm:$0xff]  }
   0x9   :  { %849 = vmatpush3.bf16.msra.mxu1 %v892_v6  ;;  %v31_v24 = vshrl.u32 %v909_v22, 16  ;;  %v33_v25 = vshll.u32 %v909_v22, 16  ;;  %v44_v26 = vshrl.u32 %v910_v23, 16  ;;  %v46_v27 = vshll.u32 %v910_v23, 16  ;;  %v908_v28 = vld [vmem:[%s1139_s1 + $0x38] sm:$0xff]   ;;  %v912_v35 = vld [vmem:[%s1141_s3 + $0x80] sm:$0xff]  }
   0xa   :  { %850 = vmatprep.subr.bf16.mxu1 %v895_v9  ;;  %v50_v29 = vrot.slane %v910_v23, 1  ;;  %v911_v30 = vld [vmem:[%s1139_s1 + $0xb8] sm:$0xff]   ;;  %v37_v31 = vrot.slane %v909_v22, 1  ;;  %v913_v42 = vld [vmem:[%s1141_s3 + $0x88] sm:$0xff]   ;;  %v914_v43 = vld [vmem:[%s1141_s3 + $0x40] sm:$0xff]  }
   0xb   :  { %775 = vmatpush3.bf16.msra.mxu0 %v893_v7  ;;  %v35_v32 = vrot.slane %v33_v25, 1  ;;  %v48_v33 = vrot.slane %v46_v27, 1  ;;  %v915_v44 = vld [vmem:[%s1141_s3] sm:$0xff]   ;;  %v916_v45 = vld [vmem:[%s1141_s3 + $0x90] sm:$0xff]   ;;  %v917_v46 = vld [vmem:[%s1141_s3 + $0x48] sm:$0xff]  }
   0xc   :  { %776 = vmatprep.subr.bf16.mxu0 %v894_v8  ;;  %v52_v34 = vrot.slane %v50_v29, 1  ;;  %v58_v40 = vsel %vm56_vm0, %v909_v22, %v50_v29  ;;  %v918_v47 = vld [vmem:[%s1141_s3 + $0x8] sm:$0xff]   ;;  %v919_v48 = vld [vmem:[%s1141_s3 + $0x98] sm:$0xff]   ;;  %v920_v49 = vld [vmem:[%s1141_s3 + $0x50] sm:$0xff]  }
   0xd   :  { %851 = vmatpush3.bf16.msra.mxu1 %v895_v9  ;;  %v36_v36 = vor.u32 %v35_v32, %v31_v24  ;;  %v49_v37 = vor.u32 %v48_v33, %v44_v26  ;;  %v921_v50 = vld [vmem:[%s1141_s3 + $0x10] sm:$0xff]   ;;  %v922_v51 = vld [vmem:[%s1141_s3 + $0xa0] sm:$0xff]   ;;  %v923_v52 = vld [vmem:[%s1141_s3 + $0x58] sm:$0xff]  }
   0xe   :  { %852 = vmatprep.subr.bf16.mxu1 %v898_v12  ;;  %v66_v38 = vsel %vm56_vm0, %v37_v31, %v52_v34  ;;  %v924_v53 = vld [vmem:[%s1141_s3 + $0x18] sm:$0xff]   ;;  %v925_v54 = vld [vmem:[%s1141_s3 + $0xa8] sm:$0xff]   ;;  %v926_v55 = vld [vmem:[%s1141_s3 + $0x60] sm:$0xff]  }
   0xf   :  { %777 = vmatpush3.bf16.msra.mxu0 %v896_v10  ;;  %v51_v39 = vrot.slane %v49_v37, 1  ;;  %862 = vmatprep.mubr.bf16.mxu1 %v66_v38  ;;  %v927_v56 = vld [vmem:[%s1141_s3 + $0x20] sm:$0xff]   ;;  %v928_v57 = vld [vmem:[%s1141_s3 + $0xb0] sm:$0xff]   ;;  %v929_v58 = vld [vmem:[%s1141_s3 + $0x68] sm:$0xff]  }
  0x10   :  { %778 = vmatprep.subr.bf16.mxu0 %v897_v11  ;;  %v930_v59 = vld [vmem:[%s1141_s3 + $0x28] sm:$0xff]   ;;  %v931_v60 = vld [vmem:[%s1141_s3 + $0xb8] sm:$0xff]   ;;  %v932_v61 = vld [vmem:[%s1141_s3 + $0x70] sm:$0xff]  }
  0x11   :  { %853 = vmatpush3.bf16.msra.mxu1 %v898_v12  ;;  %v62_v41 = vsel %vm56_vm0, %v36_v36, %v51_v39  ;;  %v933_v62 = vld [vmem:[%s1141_s3 + $0x30] sm:$0xff]   ;;  %v934_v63 = vld [vmem:[%s1141_s3 + $0x78] sm:$0xff]   ;;  %v720_v4 = vld [vmem:[%s1142_s2] ss:$0 sm:$0xff] }
  0x12   :  { %854 = vmatprep.subr.bf16.mxu1 %v901_v14  ;;  %299 = vmatprep.mubr.bf16.mxu0 %v62_v41  ;;  %v935_v0 = vld [vmem:[%s1141_s3 + $0x38] sm:$0xff]  }
  0x13   :  { %779 = vmatpush3.bf16.msra.mxu0 %v899_v13 }
  0x14   :  { %780 = vmatprep.subr.bf16.mxu0 %v900_v15 }
  0x15   :  { %855 = vmatpush3.bf16.msra.mxu1 %v901_v14 }
  0x16   :  { %856 = vmatprep.subr.bf16.mxu1 %v904_v17 }
  0x17   :  { %781 = vmatpush3.bf16.msra.mxu0 %v902_v16 }
  0x18   :  { %782 = vmatprep.subr.bf16.mxu0 %v903_v18 }
  0x19   :  { %857 = vmatpush3.bf16.msra.mxu1 %v904_v17 }
  0x1a   :  { %858 = vmatprep.subr.bf16.mxu1 %v907_v21 }
  0x1b   :  { %783 = vmatpush3.bf16.msra.mxu0 %v905_v19 }
  0x1c   :  { %784 = vmatprep.subr.bf16.mxu0 %v906_v20 }
  0x1d   :  { %859 = vmatpush3.bf16.msra.mxu1 %v907_v21 }
  0x1e   :  { %860 = vmatprep.subr.bf16.mxu1 %v911_v30 }
  0x1f   :  { %785 = vmatpush3.bf16.msra.mxu0 %v908_v28 }
  0x20   :  { %808 = vmatprep.subr.bf16.mxu0 %v914_v43 }
  0x21   :  { %861 = vmatpush3.bf16.msra.mxu1 %v911_v30 }
  0x22   :  { %866 = vmatprep.subr.bf16.mxu1 %v912_v35  ;;  %300 = vmatmul.mubr.bf16.vlgmr.msra.gmra.mrb[0].mxu0 %v58_v40 }
  0x23   :  { %307 = vmatprep.mubr.bf16.mxu0 %v51_v39  ;;  %809 = vmatpush3.bf16.msra.mxu0 %v915_v44 }
  0x24   :  { %863 = vmatmul.mubr.bf16.vlgmr.msra.gmra.mrb[0].mxu1 %v52_v34  ;;  %810 = vmatprep.subr.bf16.mxu0 %v917_v46 }
  0x25   :  { %867 = vmatpush3.bf16.msra.mxu1 %v912_v35 }
  0x26   :  { %868 = vmatprep.subr.bf16.mxu1 %v913_v42 }
  0x27   :  { %811 = vmatpush3.bf16.msra.mxu0 %v918_v47 }
  0x28   :  { %812 = vmatprep.subr.bf16.mxu0 %v920_v49 }
  0x29   :  { %869 = vmatpush3.bf16.msra.mxu1 %v913_v42 }
  0x2a   :  { %308 = vmatmul.mubr.bf16.gmra.mrb[4].mxu0 %v50_v29  ;;  %870 = vmatprep.subr.bf16.mxu1 %v916_v45 }
  0x2b   :  { %813 = vmatpush3.bf16.msra.mxu0 %v921_v50 }
  0x2c   :  { %814 = vmatprep.subr.bf16.mxu0 %v923_v52 }
  0x2d   :  { %871 = vmatpush3.bf16.msra.mxu1 %v916_v45 }
  0x2e   :  { %872 = vmatprep.subr.bf16.mxu1 %v919_v48 }
  0x2f   :  { %815 = vmatpush3.bf16.msra.mxu0 %v924_v53 }
  0x30   :  { %816 = vmatprep.subr.bf16.mxu0 %v926_v55 }
  0x31   :  { %873 = vmatpush3.bf16.msra.mxu1 %v919_v48 }
  0x32   :  { %874 = vmatprep.subr.bf16.mxu1 %v922_v51 }
  0x33   :  { %817 = vmatpush3.bf16.msra.mxu0 %v927_v56  ;;  %v745_v56 = vld [vmem:[%s1143_s4] ss:$0 sm:$0xff] }
  0x34   :  { %818 = vmatprep.subr.bf16.mxu0 %v929_v58 }
  0x35   :  { %875 = vmatpush3.bf16.msra.mxu1 %v922_v51 }
  0x36   :  { %876 = vmatprep.subr.bf16.mxu1 %v925_v54 }
  0x37   :  { %819 = vmatpush3.bf16.msra.mxu0 %v930_v59 }
  0x38   :  { %820 = vmatprep.subr.bf16.mxu0 %v932_v61 }
  0x39   :  { %877 = vmatpush3.bf16.msra.mxu1 %v925_v54 }
  0x3a   :  { %878 = vmatprep.subr.bf16.mxu1 %v928_v57 }
  0x3b   :  { %821 = vmatpush3.bf16.msra.mxu0 %v933_v62 }
  0x3c   :  { %822 = vmatprep.subr.bf16.mxu0 %v934_v63 }
  0x3d   :  { %879 = vmatpush3.bf16.msra.mxu1 %v928_v57 }
  0x3e   :  { %880 = vmatprep.subr.bf16.mxu1 %v931_v60 }
  0x3f   :  { %823 = vmatpush3.bf16.msra.mxu0 %v935_v0 }
  0x41   :  { %881 = vmatpush3.bf16.msra.mxu1 %v931_v60 }
  0xf5   :  { %v786_v1 = vpop.f32.mrb[0].mxu0 }
  0xf6   :  { %v787_v2 = vpop.f32.mrb[1].mxu0 }
  0xf7   :  { %v864_v3 = vpop.f32.mrb[0].mxu1  ;;  %v788_v5 = vadd.f32 %v787_v2, %v786_v1  ;;  %v789_v6 = vpop.f32.mrb[2].mxu0 }
  0xf8   :  { %v350_v7 = vpop.f32.mrb[1].mxu1  ;;  %v790_v8 = vpop.f32.mrb[3].mxu0 }
  0xf9   :  { %v865_v9 = vpop.f32.mrb[2].mxu1  ;;  %v791_v10 = vadd.f32 %v790_v8, %v789_v6  ;;  %v302_v11 = vadd.f32 %v788_v5, %v720_v4 }
  0xfa   :  { %v353_v12 = vpop.f32.mrb[3].mxu1 }
  0xfb   :  { %v351_v13 = vadd.f32 %v350_v7, %v302_v11  ;;  %v305_v14 = vadd.f32 %v791_v10, %v720_v4 }
  0xfd   :  { %v354_v15 = vadd.f32 %v353_v12, %v305_v14  ;;  %v792_v16 = vpop.f32.mrb[4].mxu0  ;;  %v365_v18 = vmax.f32 %v351_v13, 0.0 }
  0xfe   :  { %v793_v17 = vpop.f32.mrb[5].mxu0 }
  0xff   :  { %v366_v19 = vmax.f32 %v354_v15, 0.0  ;;  %v794_v20 = vadd.f32 %v793_v17, %v792_v16  ;;  %v795_v21 = vpop.f32.mrb[6].mxu0 }
 0x100   :  { %v796_v22 = vpop.f32.mrb[7].mxu0 }
 0x101   :  { %v369_v23 = vpack.c.bf16 %v366_v19, %v365_v18  ;;  %v310_v24 = vadd.f32 %v794_v20, %v720_v4  ;;  %v797_v25 = vadd.f32 %v796_v22, %v795_v21 }
 0x103   :  { %v359_v26 = vadd.f32 %v864_v3, %v310_v24  ;;  %v313_v27 = vadd.f32 %v797_v25, %v720_v4  ;;  %v374_v32 = vshll.u32 %v369_v23, 16  ;;  %v379_v33 = vrot.slane %v369_v23, 1 }
 0x104   :  { %v372_v36 = vshrl.u32 %v369_v23, 16 }
 0x105   :  { %v362_v28 = vadd.f32 %v865_v9, %v313_v27  ;;  %v367_v29 = vmax.f32 %v359_v26, 0.0  ;;  %v376_v41 = vrot.slane %v374_v32, 1 }
 0x107   :  { %v368_v30 = vmax.f32 %v362_v28, 0.0  ;;  %v377_v48 = vor.u32 %v376_v41, %v372_v36 }
 0x109   :  { %v370_v31 = vpack.c.bf16 %v368_v30, %v367_v29 }
 0x10b   :  { %v390_v34 = vrot.slane %v370_v31, 1  ;;  %v382_v35 = vshll.u32 %v370_v31, 16  ;;  %v386_v39 = vshrl.u32 %v370_v31, 16 }
 0x10d   :  { %v396_v37 = vrot.slane %v390_v34, 1  ;;  %v384_v38 = vrot.slane %v382_v35, 1  ;;  %v392_v40 = vsel %vm56_vm0, %v379_v33, %v390_v34 }
 0x10e   :  { %v403_v42 = vsel %vm401_vm1, %v369_v23, %v392_v40 }
 0x10f   :  { %v411_v43 = vsel %vm401_vm1, %v379_v33, %v396_v37  ;;  %v385_v44 = vsel %vm380_vm2, %v372_v36, %v384_v38  ;;  %v388_v45 = vor.u32 %v386_v39, %v384_v38 }
 0x110   :  { %882 = vmatprep.mubr.bf16.mxu1 %v411_v43  ;;  %v393_v46 = vrot.slane %v385_v44, 1 }
 0x111   :  { %883 = vmatmul.mubr.bf16.vlgmr.msra.gmra.mrb[4].mxu1 %v396_v37  ;;  %v394_v47 = vrot.slane %v388_v45, 1 }
 0x113   :  { %v395_v49 = vsel %vm56_vm0, %v393_v46, %v394_v47 }
 0x114   :  { %v407_v50 = vsel %vm401_vm1, %v377_v48, %v395_v49 }
 0x115   :  { %644 = vmatprep.mubr.bf16.mxu0 %v407_v50 }
 0x116   :  { %645 = vmatmul.mubr.bf16.vlgmr.msra.gmra.mrb[8].mxu0 %v403_v42 }
 0x117   :  { %652 = vmatprep.mubr.bf16.mxu0 %v394_v47 }
 0x11e   :  { %653 = vmatmul.mubr.bf16.gmra.mrb[12].mxu0 %v390_v34 }
 0x1e4   :  { %v884_v51 = vpop.f32.mrb[4].mxu1 }
 0x1e5   :  { %v694_v52 = vpop.f32.mrb[5].mxu1 }
 0x1e6   :  { %v885_v53 = vpop.f32.mrb[6].mxu1 }
 0x1e7   :  { %v697_v54 = vpop.f32.mrb[7].mxu1 }
 0x1e9   :  { %v824_v55 = vpop.f32.mrb[8].mxu0 }
 0x1ea   :  { %v825_v57 = vpop.f32.mrb[9].mxu0 }
 0x1eb   :  { %v826_v58 = vadd.f32 %v825_v57, %v824_v55  ;;  %v827_v59 = vpop.f32.mrb[10].mxu0 }
 0x1ec   :  { %v828_v60 = vpop.f32.mrb[11].mxu0 }
 0x1ed   :  { %v647_v61 = vadd.f32 %v826_v58, %v745_v56  ;;  %v829_v62 = vadd.f32 %v828_v60, %v827_v59 }
 0x1ef   :  { %v695_v63 = vadd.f32 %v694_v52, %v647_v61  ;;  %v650_v0 = vadd.f32 %v829_v62, %v745_v56 }
 0x1f1   :  { %v708_v1 = vmax.f32 %v695_v63, 0.0  ;;  %v698_v2 = vadd.f32 %v697_v54, %v650_v0  ;;  %v830_v3 = vpop.f32.mrb[12].mxu0 }
 0x1f2   :  { %v831_v4 = vpop.f32.mrb[13].mxu0 }
 0x1f3   :  { %711 = vst [vmem:[%s1144_s5] sm:$0xff] %v708_v1  ;;  %v709_v5 = vmax.f32 %v698_v2, 0.0  ;;  %v832_v6 = vadd.f32 %v831_v4, %v830_v3  ;;  %v833_v7 = vpop.f32.mrb[14].mxu0 }
 0x1f4   :  { %v834_v8 = vpop.f32.mrb[15].mxu0 }
 0x1f5   :  { %712 = vst [vmem:[%s1144_s5 + $0x8] sm:$0xff] %v709_v5  ;;  %v655_v9 = vadd.f32 %v832_v6, %v745_v56 }
 0x1f7   :  { %v703_v10 = vadd.f32 %v884_v51, %v655_v9 }
 0x1f9   :  { %v710_v11 = vmax.f32 %v703_v10, 0.0 }
 0x1fb   :  { %713 = vst [vmem:[%s1144_s5 + $0x10] sm:$0xff] %v710_v11 }

</bundles_post_ra>
